<compile_context>
chip_gen: v7x
topology: tpu7x:2x2x1
jax: 0.10.0
libtpu: 0.0.40
codegen_flags: <defaults>
</compile_context>

<pallas_src>
import numpy as np
import jax
import jax.numpy as jnp
from jax.experimental import pallas as pl
from jax.experimental.pallas import tpu as pltpu


# --------------------------------------------------------------------------
# Kernel
# --------------------------------------------------------------------------
def _shift_predictor_kernel(x1_ref, x2_ref, w1_ref, w2_ref, b_ref, o_ref):
    # Split linear layer:  concat([x1, x2]) @ W  ==  x1 @ W_top + x2 @ W_bot.
    # Accumulate in f32 regardless of input dtype; bias is f32; downcast only
    # at the final store.
    acc = jnp.dot(x1_ref[...], w1_ref[...], preferred_element_type=jnp.float32)
    acc = acc + jnp.dot(x2_ref[...], w2_ref[...],
                        preferred_element_type=jnp.float32)
    o_ref[...] = (acc + b_ref[...]).astype(o_ref.dtype)


# --------------------------------------------------------------------------
# Helpers
# --------------------------------------------------------------------------
def _round_up(x, m):
    return ((x + m - 1) // m) * m


def _cdiv(a, b):
    return -(-a // b)


def _choose_batch_tile(B, max_batch_tile):
    """Largest tile covering B (grid=1) for small/medium batches; for large
    batches an EVEN grid of >=256-row tiles (good for v7x's 2 TCs, still
    well-amortized on single-TC v5e/v6e)."""
    B8 = _round_up(max(B, 1), 8)
    max_t = max(256, _round_up(int(max_batch_tile), 8))
    if B8 < 2 * 256:
        # Too small to be worth splitting: a single grid step (no forced
        # 2-step grid on single-TC chips).
        return min(B8, max_t)
    n_steps = max(2, 2 * _cdiv(B8, 2 * max_t))          # even step count
    return min(_round_up(_cdiv(B8, n_steps), 8), max_t)


def _invariant_spec(block_shape):
    """BlockSpec for a grid-invariant operand (constant index_map).  Single-
    buffered when the JAX build supports pipeline_mode, so the pipeline does
    not allocate a redundant second VMEM copy."""
    index_map = lambda i: (0,) * len(block_shape)
    try:
        return pl.BlockSpec(block_shape, index_map,
                            pipeline_mode=pl.Buffered(1))
    except TypeError:  # older builds without pipeline_mode kwarg
        return pl.BlockSpec(block_shape, index_map)


# --------------------------------------------------------------------------
# One-time parameter preparation (hoisted out of the per-call wrapper)
# --------------------------------------------------------------------------
def prepare_shift_predictor_params(w_t, bias, *, compute_dtype=None):
    """Split/pad the Linear parameters once.

    Args:
      w_t:  (in_dim, out_f) weight, i.e. PyTorch Linear weight transposed.
      bias: (out_f,) or (1, out_f).
      compute_dtype: dtype for the weight halves (e.g. jnp.bfloat16 to halve
        HBM traffic).  The bias always stays float32.
    Returns:
      dict with pre-split, lane-padded parameters consumed by
      `latent_shift_predictor`.
    """
    in_dim, out_f = w_t.shape
    assert in_dim % 2 == 0, "in_dim must be even (two concatenated latents)"
    half = in_dim // 2
    out_fp = _round_up(out_f, 128)

    wd = compute_dtype if compute_dtype is not None else w_t.dtype
    w1 = w_t[:half, :].astype(wd)
    w2 = w_t[half:, :].astype(wd)
    b2 = jnp.reshape(bias, (1, out_f)).astype(jnp.float32)   # bias stays f32
    if out_fp != out_f:
        pad = out_fp - out_f
        w1 = jnp.pad(w1, ((0, 0), (0, pad)))
        w2 = jnp.pad(w2, ((0, 0), (0, pad)))
        b2 = jnp.pad(b2, ((0, 0), (0, pad)))
    return {"w1": w1, "w2": w2, "b": b2, "half": half, "out_f": out_f}


# --------------------------------------------------------------------------
# Forward pass
# --------------------------------------------------------------------------
def latent_shift_predictor(x1, x2, params, *, batch_tile=None,
                           max_batch_tile=1024, out_dtype=None):
    """Forward of LatentShiftPredictor: cat([x1, x2], 1) @ W + b.

    Args:
      x1, x2: (B, in_dim // 2) latent codes.
      params: output of `prepare_shift_predictor_params`.
      out_dtype: output dtype (defaults to the input dtype of x1).
    Returns:
      (B, out_f) logits.
    """
    B, half = x1.shape
    assert x2.shape == (B, half)
    w1, w2, b2 = params["w1"], params["w2"], params["b"]
    out_f = params["out_f"]
    assert params["half"] == half and w1.shape[0] == half
    out_fp = w1.shape[1]

    orig_dtype = x1.dtype
    if out_dtype is None:
        out_dtype = orig_dtype

    # bf16 (or other) compute path: activations match the weight dtype;
    # accumulation and bias stay f32 inside the kernel.
    compute_dtype = w1.dtype
    if x1.dtype != compute_dtype:
        x1 = x1.astype(compute_dtype)
        x2 = x2.astype(compute_dtype)

    if batch_tile is None:
        batch_tile = _choose_batch_tile(B, max_batch_tile)
    batch_tile = max(8, _round_up(int(batch_tile), 8))

    # Ragged batch handled in-kernel: the final (possibly partial) tile's
    # out-of-bounds rows are clipped on writeback -- no jnp.pad / out[:B].
    grid = (pl.cdiv(B, batch_tile),)

    out = pl.pallas_call(
        _shift_predictor_kernel,
        out_shape=jax.ShapeDtypeStruct((B, out_fp), out_dtype),
        grid_spec=pltpu.PrefetchScalarGridSpec(
            num_scalar_prefetch=0,
            grid=grid,
            in_specs=[
                pl.BlockSpec((batch_tile, half), lambda i: (i, 0)),  # x1 tile
                pl.BlockSpec((batch_tile, half), lambda i: (i, 0)),  # x2 tile
                _invariant_spec((half, out_fp)),                     # W top
                _invariant_spec((half, out_fp)),                     # W bottom
                _invariant_spec((1, out_fp)),                        # bias(f32)
            ],
            out_specs=pl.BlockSpec((batch_tile, out_fp), lambda i: (i, 0)),
        ),
        compiler_params=pltpu.CompilerParams(
            dimension_semantics=("parallel",),
        ),
    )(x1, x2, w1, w2, b2)

    # Only slice if the output lane dim actually needed padding.
    if out_fp != out_f:
        out = out[:, :out_f]
    return out


# --------------------------------------------------------------------------
# Demo / self-check
# --------------------------------------------------------------------------
if __name__ == "__main__":
    # Shapes consistent with the module:
    #   latent dim per input = 64  ->  in_dim = 128 after concat
    #   out_dim = (8, 16)          ->  prod(out_dim) = 128 output logits
    B = 8
    half_dim = 64
    in_dim = 2 * half_dim
    out_dim = (8, 16)
    out_f = int(np.prod(out_dim))

    key = jax.random.PRNGKey(0)
    k_x1, k_x2, k_w, k_b, k_r1, k_r2 = jax.random.split(key, 6)

    x1 = jax.random.normal(k_x1, (B, half_dim), dtype=jnp.float32)
    x2 = jax.random.normal(k_x2, (B, half_dim), dtype=jnp.float32)

    # Deterministic synthetic parameters for nn.Linear(in_dim, prod(out_dim)).
    # (PyTorch stores weight as (out_f, in_dim); we keep the transposed copy.)
    bound = 1.0 / np.sqrt(in_dim)
    w = jax.random.uniform(k_w, (out_f, in_dim), dtype=jnp.float32,
                           minval=-bound, maxval=bound)
    b = jax.random.uniform(k_b, (out_f,), dtype=jnp.float32,
                           minval=-bound, maxval=bound)
    w_t = jnp.transpose(w)          # (in_dim, out_f)

    # ---- f32 path (exact reference check) --------------------------------
    params_f32 = prepare_shift_predictor_params(w_t, b)
    logits = jax.block_until_ready(latent_shift_predictor(x1, x2, params_f32))
    ref = jnp.concatenate([x1, x2], axis=1) @ w_t + b[None, :]
    np.testing.assert_allclose(np.asarray(logits), np.asarray(ref),
                               rtol=1e-5, atol=1e-5)

    # ---- ragged batch (no wrapper pad/slice; last tile clipped in-kernel) -
    Br = 300
    x1r = jax.random.normal(k_r1, (Br, half_dim), dtype=jnp.float32)
    x2r = jax.random.normal(k_r2, (Br, half_dim), dtype=jnp.float32)
    logits_r = jax.block_until_ready(
        latent_shift_predictor(x1r, x2r, params_f32))
    ref_r = jnp.concatenate([x1r, x2r], axis=1) @ w_t + b[None, :]
    np.testing.assert_allclose(np.asarray(logits_r), np.asarray(ref_r),
                               rtol=1e-5, atol=1e-5)

    # ---- bf16 compute path (halved HBM traffic; f32 bias + accumulation) --
    params_bf16 = prepare_shift_predictor_params(
        w_t, b, compute_dtype=jnp.bfloat16)
    logits_bf16 = jax.block_until_ready(
        latent_shift_predictor(x1, x2, params_bf16, out_dtype=jnp.float32))
    np.testing.assert_allclose(np.asarray(logits_bf16), np.asarray(ref),
                               rtol=5e-2, atol=5e-2)

    print("KERNEL_OK")
</pallas_src>

<mosaic_0001>
module attributes {stable_mosaic.version = 11 : i64} {
  func.func @_shift_predictor_kernel(%arg0: i32, %arg1: memref<8x64xf32, #tpu.memory_space<vmem>>, %arg2: memref<8x64xf32, #tpu.memory_space<vmem>>, %arg3: memref<64x128xf32, #tpu.memory_space<vmem>>, %arg4: memref<64x128xf32, #tpu.memory_space<vmem>>, %arg5: memref<1x128xf32, #tpu.memory_space<vmem>>, %arg6: memref<8x128xf32, #tpu.memory_space<vmem>>) attributes {dimension_semantics = [#tpu.dimension_semantics<parallel>], iteration_bounds = array<i64: 1>, scalar_prefetch = 0 : i64, scratch_operands = 0 : i64, tpu.core_type = #tpu.core_type<tc>, window_params = [{transform_indices = @transform_0, window_bounds = array<i64: 8, 64>}, {transform_indices = @transform_1, window_bounds = array<i64: 8, 64>}, {pipeline_mode = #tpu.pipeline_mode<synchronous>, transform_indices = @transform_2, window_bounds = array<i64: 64, 128>}, {pipeline_mode = #tpu.pipeline_mode<synchronous>, transform_indices = @transform_3, window_bounds = array<i64: 64, 128>}, {pipeline_mode = #tpu.pipeline_mode<synchronous>, transform_indices = @transform_4, window_bounds = array<i64: 1, 128>}, {transform_indices = @transform_5, window_bounds = array<i64: 8, 128>}]} {
    %c0 = arith.constant 0 : index
    %c0_0 = arith.constant 0 : index
    %0 = vector.load %arg1[%c0, %c0_0] : memref<8x64xf32, #tpu.memory_space<vmem>>, vector<8x64xf32>
    %c0_1 = arith.constant 0 : index
    %c0_2 = arith.constant 0 : index
    %1 = vector.load %arg3[%c0_1, %c0_2] : memref<64x128xf32, #tpu.memory_space<vmem>>, vector<64x128xf32>
    %cst = arith.constant dense<0.000000e+00> : vector<8x128xf32>
    %2 = tpu.matmul %0, %1, %cst {dimension_numbers = #tpu.dot_dimension_numbers<[1], [0], [0], [1], [0, 0, 1, 1], [], []>} : vector<8x64xf32>, vector<64x128xf32>, vector<8x128xf32> -> vector<8x128xf32>
    %c0_3 = arith.constant 0 : index
    %c0_4 = arith.constant 0 : index
    %3 = vector.load %arg2[%c0_3, %c0_4] : memref<8x64xf32, #tpu.memory_space<vmem>>, vector<8x64xf32>
    %c0_5 = arith.constant 0 : index
    %c0_6 = arith.constant 0 : index
    %4 = vector.load %arg4[%c0_5, %c0_6] : memref<64x128xf32, #tpu.memory_space<vmem>>, vector<64x128xf32>
    %cst_7 = arith.constant dense<0.000000e+00> : vector<8x128xf32>
    %5 = tpu.matmul %3, %4, %cst_7 {dimension_numbers = #tpu.dot_dimension_numbers<[1], [0], [0], [1], [0, 0, 1, 1], [], []>} : vector<8x64xf32>, vector<64x128xf32>, vector<8x128xf32> -> vector<8x128xf32>
    %6 = arith.addf %2, %5 : vector<8x128xf32>
    %c0_8 = arith.constant 0 : index
    %c0_9 = arith.constant 0 : index
    %7 = vector.load %arg5[%c0_8, %c0_9] : memref<1x128xf32, #tpu.memory_space<vmem>>, vector<1x128xf32>
    %8 = vector.broadcast %7 : vector<1x128xf32> to vector<8x128xf32>
    %9 = arith.addf %6, %8 : vector<8x128xf32>
    %c0_10 = arith.constant 0 : index
    %c0_11 = arith.constant 0 : index
    %10 = vector.load %arg6[%c0_10, %c0_11] : memref<8x128xf32, #tpu.memory_space<vmem>>, vector<8x128xf32>
    tpu.vector_store %arg6[%c0_10, %c0_11], %9 {strides = array<i32>} : memref<8x128xf32, #tpu.memory_space<vmem>>, vector<8x128xf32>,
    return
  }
  func.func @transform_0(%arg0: i32) -> (i32, i32) {
    %c0_i32 = arith.constant 0 : i32
    %c0_i32_0 = arith.constant 0 : i32
    return %arg0, %c0_i32 : i32, i32
  }
  func.func @transform_1(%arg0: i32) -> (i32, i32) {
    %c0_i32 = arith.constant 0 : i32
    %c0_i32_0 = arith.constant 0 : i32
    return %arg0, %c0_i32 : i32, i32
  }
  func.func @transform_2(%arg0: i32) -> (i32, i32) {
    %c0_i32 = arith.constant 0 : i32
    %c0_i32_0 = arith.constant 0 : i32
    %c0_i32_1 = arith.constant 0 : i32
    return %c0_i32, %c0_i32_0 : i32, i32
  }
  func.func @transform_3(%arg0: i32) -> (i32, i32) {
    %c0_i32 = arith.constant 0 : i32
    %c0_i32_0 = arith.constant 0 : i32
    %c0_i32_1 = arith.constant 0 : i32
    return %c0_i32, %c0_i32_0 : i32, i32
  }
  func.func @transform_4(%arg0: i32) -> (i32, i32) {
    %c0_i32 = arith.constant 0 : i32
    %c0_i32_0 = arith.constant 0 : i32
    %c0_i32_1 = arith.constant 0 : i32
    return %c0_i32, %c0_i32_0 : i32, i32
  }
  func.func @transform_5(%arg0: i32) -> (i32, i32) {
    %c0_i32 = arith.constant 0 : i32
    %c0_i32_0 = arith.constant 0 : i32
    return %arg0, %c0_i32 : i32, i32
  }
}

</mosaic_0001>

<bundles_post_ra>
// kernel: tpu_custom_call.1
= control target key start
LH: loop header
LB: loop body
LE: loop exit
PB: predicated region body
PF: predicated region fallthrough
CT: control target
= control target key end

     0   :  { %10 = vsyncpa [#allocation3], 0  ;;  %s577_s0 = inlined_call_operand.hbm [shape: f32[8,64], index: 0, kind: input, shape index: {}]   ;;  %s578_s1 = inlined_call_operand.hbm [shape: f32[8,64], index: 1, kind: input, shape index: {}]   ;;  %s579_s2 = inlined_call_operand.hbm [shape: f32[64,128], index: 2, kind: input, shape index: {}]   ;;  %s580_s3 = inlined_call_operand.hbm [shape: f32[64,128], index: 3, kind: input, shape index: {}]   ;;  %s581_s4 = inlined_call_operand.vmem [shape: f32[1,128], index: 4, kind: input, shape index: {}]   ;;  %s582_s5 = inlined_call_operand.hbm [shape: f32[8,128], index: 5, kind: output, shape index: {}]  }
   0x1   :  { %11 = vsyncpa [#allocation6], 0 }
   0x2   :  { %12 = vsyncpa [#allocation9], 0 }
   0x3   :  { %13 = vsyncpa [#allocation4], 0  ;;  %s474_s18 = smov [#allocation5]   ;;  %s475_s20 = smov [#allocation2]  }
   0x4   :  { %s30_s19 = sshll.u32 %s474_s18, 4  ;;  %s20_s21 = sshll.u32 %s475_s20, 4  ;;  %s31_s19 = int_to_ptr.vmem [resolvable:$true] %s30_s19  ;;  %s21_s21 = int_to_ptr.vmem [resolvable:$true] %s20_s21 }
   0x5   :  { %s356_s24 = scalar_lea.hbm %s578_s1, 128 }
   0x6   :  { %p357_p0 = scmp.ne.s32.totalorder %s578_s1, %s356_s24  ;;  %p360_p1 = scmp.lt.u32.totalorder %s356_s24, %s578_s1 }
   0x8   :  { %p362_p2 = pnand %p360_p1, %p357_p0 }
   0xa   :  { %365 = shalt.err (!%p362_p2)
}
   0xb   :  { %s366_s29 = scalar_lea.vmem %s31_s19, 128  ;;  %p371_p4 = scmp.lt.s32.totalorder %s31_s19, %s31_s19 }
   0xc   :  { %p367_p3 = scmp.ne.s32.totalorder %s31_s19, %s366_s29  ;;  %p372_p5 = scmp.lt.s32.totalorder %s366_s29, %s366_s29 }
   0xe   :  { %p373_p6 = por %p372_p5, %p371_p4 }
  0x10   :  { %p374_p7 = pnand %p373_p6, %p367_p3 }
  0x12   :  { %377 = shalt.err (!%p374_p7)
}
  0x13   :  { %33 = dma.hbm_to_vmem [thread:$0]  %s578_s1, 128, %s31_s19, [#allocation6]  }
  0x14   :  { %s378_s9 = scalar_lea.hbm %s577_s0, 128 }
  0x15   :  { %p379_p8 = scmp.ne.s32.totalorder %s577_s0, %s378_s9  ;;  %p382_p9 = scmp.lt.u32.totalorder %s378_s9, %s577_s0 }
  0x17   :  { %p384_p10 = pnand %p382_p9, %p379_p8 }
  0x19   :  { %387 = shalt.err (!%p384_p10)
}
  0x1a   :  { %s388_s14 = scalar_lea.vmem %s21_s21, 128  ;;  %p393_p12 = scmp.lt.s32.totalorder %s21_s21, %s21_s21 }
  0x1b   :  { %p389_p11 = scmp.ne.s32.totalorder %s21_s21, %s388_s14  ;;  %p394_p13 = scmp.lt.s32.totalorder %s388_s14, %s388_s14 }
  0x1d   :  { %p395_p0 = por %p394_p13, %p393_p12 }
  0x1f   :  { %p396_p1 = pnand %p395_p0, %p389_p11 }
  0x21   :  { %399 = shalt.err (!%p396_p1)
}
  0x22   :  { %23 = dma.hbm_to_vmem [thread:$0]  %s577_s0, 128, %s21_s21, [#allocation3]  }
  0x23   :  { %s476_s16 = smov [#allocation7]   ;;  %s400_s20 = scalar_lea.hbm %s579_s2, 1024 }
  0x24   :  { %s39_s17 = sshll.u32 %s476_s16, 4  ;;  %p401_p2 = scmp.ne.s32.totalorder %s579_s2, %s400_s20  ;;  %s40_s17 = int_to_ptr.vmem [resolvable:$true] %s39_s17 }
  0x25   :  { %p404_p3 = scmp.lt.u32.totalorder %s400_s20, %s579_s2 }
  0x27   :  { %p406_p4 = pnand %p404_p3, %p401_p2 }
  0x29   :  { %409 = shalt.err (!%p406_p4)
}
  0x2a   :  { %s410_s26 = scalar_lea.vmem %s40_s17, 1024  ;;  %p415_p6 = scmp.lt.s32.totalorder %s40_s17, %s40_s17 }
  0x2b   :  { %p411_p5 = scmp.ne.s32.totalorder %s40_s17, %s410_s26  ;;  %p416_p7 = scmp.lt.s32.totalorder %s410_s26, %s410_s26 }
  0x2d   :  { %p417_p8 = por %p416_p7, %p415_p6 }
  0x2f   :  { %p418_p9 = pnand %p417_p8, %p411_p5 }
  0x31   :  { %421 = shalt.err (!%p418_p9)
}
  0x32   :  { %s477_s0 = smov 128   ;;  %s478_s21 = smov 8  }
  0x33   :  { %45 = dma.hbm_to_vmem [thread:$0]  %s579_s2, 1024, %s40_s17, [#allocation6], %s477_s0, %s477_s0, %s478_s21  }
  0x34   :  { %s479_s29 = smov [#allocation8]   ;;  %s422_s8 = scalar_lea.hbm %s580_s3, 1024 }
  0x35   :  { %s51_s30 = sshll.u32 %s479_s29, 4  ;;  %p423_p10 = scmp.ne.s32.totalorder %s580_s3, %s422_s8  ;;  %s52_s30 = int_to_ptr.vmem [resolvable:$true] %s51_s30 }
  0x36   :  { %p426_p11 = scmp.lt.u32.totalorder %s422_s8, %s580_s3 }
  0x38   :  { %p428_p12 = pnand %p426_p11, %p423_p10 }
  0x3a   :  { %431 = shalt.err (!%p428_p12)
}
  0x3b   :  { %s432_s13 = scalar_lea.vmem %s52_s30, 1024  ;;  %p437_p0 = scmp.lt.s32.totalorder %s52_s30, %s52_s30 }
  0x3c   :  { %p433_p13 = scmp.ne.s32.totalorder %s52_s30, %s432_s13  ;;  %p438_p1 = scmp.lt.s32.totalorder %s432_s13, %s432_s13 }
  0x3e   :  { %p439_p2 = por %p438_p1, %p437_p0 }
  0x40   :  { %p440_p3 = pnand %p439_p2, %p433_p13 }
  0x42   :  { %443 = shalt.err (!%p440_p3)
}
  0x43   :  { %57 = dma.hbm_to_vmem [thread:$0]  %s580_s3, 1024, %s52_s30, [#allocation9], %s477_s0, %s477_s0, %s478_s21  }
  0x44   :  { %466 = dma.done.wait [#allocation3], 128  }
  0x45   :  { %467 = vsyncadd [#allocation3], 4294967168 }
  0x46   :  { %468 = dma.done.wait [#allocation6], 1152  }
  0x47   :  { %469 = vsyncadd [#allocation6], 4294966144 }
  0x48   :  { %470 = dma.done.wait [#allocation9], 1024  }
  0x49   :  { %471 = vsyncadd [#allocation9], 4294966272  ;;  %v480_v0 = vmov 0.0|0.0   ;;  %vm481_vm0 = vmmov 0   ;;  %v482_v1 = vmov 0.0   ;;  %v82_v2 = vld [vmem:[#allocation8] sm:$0xff] }
  0x4a   :  { %322 = vmatprep.subr.bf16.mxu0 %v480_v0  ;;  %334 = vmatprep.subr.bf16.mxu1 %v480_v0  ;;  %v83_v3 = vld [vmem:[#allocation8 + $0x8] sm:$0xff]  ;;  %v73_v4 = vld [vmem:[#allocation7] sm:$0xff]  ;;  %v84_v7 = vld [vmem:[#allocation8 + $0x10] sm:$0xff]  ;;  %vm90_vm1 = vcmask 523264   ;;  %s483_s15 = smov [#allocation10]  }
  0x4b   :  { %300 = vmatprep.mubr.msk.f32.mxu0 %vm481_vm0, %v482_v1  ;;  %319 = vmatprep.mubr.msk.f32.mxu1 %vm481_vm0, %v482_v1  ;;  %v323_v5 = vpack.c.bf16 %v83_v3, %v82_v2  ;;  %v74_v6 = vld [vmem:[#allocation7 + $0x8] sm:$0xff]  ;;  %v85_v8 = vld [vmem:[#allocation8 + $0x18] sm:$0xff]  ;;  %v75_v10 = vld [vmem:[#allocation7 + $0x10] sm:$0xff]  ;;  %s252_s16 = sshll.u32 %s483_s15, 4  ;;  %s253_s16 = int_to_ptr.vmem [resolvable:$true] %s252_s16 }
  0x4c   :  { %v335_v9 = vpack.c.bf16 %v74_v6, %v73_v4  ;;  %v76_v11 = vld [vmem:[#allocation7 + $0x18] sm:$0xff]  ;;  %v326_v12 = vpack.c.bf16 %v85_v8, %v84_v7  ;;  %v86_v14 = vld [vmem:[#allocation8 + $0x20] sm:$0xff]  ;;  %v87_v15 = vld [vmem:[#allocation8 + $0x28] sm:$0xff]  ;;  %s444_s17 = scalar_lea.vmem %s253_s16, 128  ;;  %p449_p5 = scmp.lt.s32.totalorder %s253_s16, %s253_s16 }
  0x4d   :  { %324 = vmatpush3.bf16.msra.mxu0 %v323_v5  ;;  %v338_v13 = vpack.c.bf16 %v76_v11, %v75_v10  ;;  %v77_v16 = vld [vmem:[#allocation7 + $0x20] sm:$0xff]  ;;  %v78_v17 = vld [vmem:[#allocation7 + $0x28] sm:$0xff]  ;;  %v329_v18 = vpack.c.bf16 %v87_v15, %v86_v14  ;;  %v88_v20 = vld [vmem:[#allocation8 + $0x30] sm:$0xff]  ;;  %p445_p4 = scmp.ne.s32.totalorder %s253_s16, %s444_s17  ;;  %p450_p6 = scmp.lt.s32.totalorder %s444_s17, %s444_s17 }
  0x4e   :  { %336 = vmatpush3.bf16.msra.mxu1 %v335_v9  ;;  %325 = vmatprep.subr.bf16.mxu0 %v480_v0  ;;  %v341_v19 = vpack.c.bf16 %v78_v17, %v77_v16  ;;  %v89_v21 = vld [vmem:[#allocation8 + $0x38] sm:$0xff]  ;;  %v79_v22 = vld [vmem:[#allocation7 + $0x30] sm:$0xff] }
  0x4f   :  { %337 = vmatprep.subr.bf16.mxu1 %v480_v0  ;;  %v80_v23 = vld [vmem:[#allocation7 + $0x38] sm:$0xff]  ;;  %v332_v24 = vpack.c.bf16 %v89_v21, %v88_v20  ;;  %v72_v27 = vld [vmem:[#allocation2] sm:$0xff]  ;;  %p451_p7 = por %p450_p6, %p449_p5 }
  0x50   :  { %v344_v25 = vpack.c.bf16 %v80_v23, %v79_v22  ;;  %v81_v26 = vld [vmem:[#allocation5] sm:$0xff]  ;;  %v265_v30 = vld [vmem:[%s581_s4] ss:$0 sm:$0xff] }
  0x51   :  { %327 = vmatpush3.bf16.msra.mxu0 %v326_v12  ;;  %p452_p8 = pnand %p451_p7, %p445_p4 }
  0x52   :  { %339 = vmatpush3.bf16.msra.mxu1 %v338_v13  ;;  %328 = vmatprep.subr.bf16.mxu0 %v480_v0 }
  0x53   :  { %340 = vmatprep.subr.bf16.mxu1 %v480_v0 }
  0x55   :  { %330 = vmatpush3.bf16.msra.mxu0 %v329_v18 }
  0x56   :  { %342 = vmatpush3.bf16.msra.mxu1 %v341_v19  ;;  %331 = vmatprep.subr.bf16.mxu0 %v480_v0 }
  0x57   :  { %343 = vmatprep.subr.bf16.mxu1 %v480_v0 }
  0x59   :  { %333 = vmatpush3.bf16.msra.mxu0 %v332_v24 }
  0x5a   :  { %345 = vmatpush3.bf16.msra.mxu1 %v344_v25 }
  0x5c   :  { %301 = vmatmul.mubr.msk.f32.vlgmr.msra.gmra.mrb[0].mxu0 %vm90_vm1, %v81_v26 }
  0x5d   :  { %320 = vmatmul.mubr.msk.f32.vlgmr.msra.gmra.mrb[0].mxu1 %vm90_vm1, %v72_v27 }
 0x12f   :  { %v160_v28 = vpop.f32.mrb[0].mxu0 }
 0x130   :  { %v233_v29 = vpop.f32.mrb[0].mxu1  ;;  %v302_v31 = vpop.f32.mrb[1].mxu0 }
 0x131   :  { %v234_v32 = vadd.f32 %v233_v29, %v160_v28  ;;  %v321_v33 = vpop.f32.mrb[1].mxu1 }
 0x133   :  { %v244_v34 = vadd.f32 %v265_v30, %v234_v32 }
 0x135   :  { %245 = vst [vmem:[#allocation10] sm:$0xff] %v244_v34 }
 0x136   :  { %455 = shalt.err (!%p452_p8)
}
 0x137   :  { %s456_s20 = scalar_lea.hbm %s582_s5, 128 }
 0x138   :  { %p457_p9 = scmp.ne.s32.totalorder %s582_s5, %s456_s20  ;;  %p460_p10 = scmp.lt.u32.totalorder %s456_s20, %s582_s5 }
 0x13a   :  { %p462_p11 = pnand %p460_p10, %p457_p9 }
 0x13c   :  { %465 = shalt.err (!%p462_p11)
}
 0x13d   :  { %255 = dma.vmem_to_hbm [thread:$0]  %s253_s16, 128, %s582_s5, [#allocation4]  }
 0x13e   :  { %472 = dma.done.wait [#allocation4], 128  }
 0x13f   :  { %473 = vsyncadd [#allocation4], 4294967168 }
 0x140   :  { %259 = vsyncpa [#allocation3], 1 }
 0x141   :  { %260 = vsyncpa [#allocation6], 1 }
 0x142   :  { %261 = vsyncpa [#allocation9], 1 }
 0x143   :  { %262 = vsyncpa [#allocation4], 1 }

</bundles_post_ra>
